<compile_context>
chip_gen: v5e
topology: v5e:2x2
jax: 0.10.0
libtpu: 0.0.40
codegen_flags: <defaults>
</compile_context>

<pallas_src>
import jax
import jax.numpy as jnp
from jax.experimental import pallas as pl
from jax.experimental.pallas import tpu as pltpu


# ----------------------------------------------------------------------------
# Kernels
# ----------------------------------------------------------------------------
def wavernn_seq_kernel(ht0_ref, ix_ref, R_ref, ht_out_ref, h_carry):
    """Sequential recurrence: K timesteps per grid iteration.

    ht0_ref : (Bs, H)      initial hidden state (resident per shard)
    ix_ref  : (K, Bs, 3H)  precomputed input projections, gate biases folded
    R_ref   : (H, 3H)      fused recurrent weights [Ru | Rr | Re] (resident)
    ht_out_ref : (K, Bs, H)
    h_carry : VMEM scratch (Bs, H) f32 -- hidden state carried across grid.
    """
    H = h_carry.shape[1]
    K = ix_ref.shape[0]
    tb = pl.program_id(1)  # timestep-block index (axis 0 is the batch shard)

    @pl.when(tb == 0)
    def _():
        h_carry[...] = ht0_ref[...].astype(jnp.float32)

    ht = h_carry[...]                                         # (Bs, H) f32
    for k in range(K):                                        # static unroll, K small
        # Single fused MXU dot for all three gates.
        r3 = jnp.dot(ht.astype(R_ref.dtype), R_ref[...],
                     preferred_element_type=jnp.float32)      # (Bs, 3H)
        ix = ix_ref[k]                                        # (Bs, 3H), biases folded
        ut = jax.nn.sigmoid(r3[:, :H] + ix[:, :H])
        rt = jax.nn.sigmoid(r3[:, H:2 * H] + ix[:, H:2 * H])
        et = jnp.tanh(rt * r3[:, 2 * H:] + ix[:, 2 * H:])
        ht = et + ut * (ht - et)                              # == ut*ht + (1-ut)*et
        ht_out_ref[k] = ht.astype(ht_out_ref.dtype)
    h_carry[...] = ht


def wavernn_head_kernel(h_ref, W1_ref, b1_ref, W2_ref, b2_ref, p_ref):
    """Batched (timestep-independent) output MLP over a row tile."""
    x = h_ref[...]
    h1 = jnp.maximum(
        jnp.dot(x.astype(W1_ref.dtype), W1_ref[...],
                preferred_element_type=jnp.float32) + b1_ref[...],
        0.0)
    p_ref[...] = (
        jnp.dot(h1.astype(W2_ref.dtype), W2_ref[...],
                preferred_element_type=jnp.float32) + b2_ref[...]
    ).astype(p_ref.dtype)


# ----------------------------------------------------------------------------
# pallas_call wrappers
# ----------------------------------------------------------------------------
def _run_recurrence(packed, ht0, ix_seq, *, steps_per_block, batch_shards):
    """One pallas_call for the whole (padded) sequence. Returns (T_pad, B, H)."""
    T_pad, B, threeH = ix_seq.shape
    H = ht0.shape[1]
    K = steps_per_block
    Tb = T_pad // K
    Bs = B // batch_shards
    R = packed["R"]

    # VMEM budget: 2 buffers per pipelined block (resident weights may also be
    # double-buffered by the emitter) + state scratch + headroom.
    bytes_R = int(R.size) * R.dtype.itemsize
    bytes_h0 = Bs * H * ht0.dtype.itemsize
    bytes_in = K * Bs * threeH * 4
    bytes_out = K * Bs * H * 4
    vmem_limit = (2 * (bytes_R + bytes_h0 + bytes_in + bytes_out)
                  + Bs * H * 4 + (2 << 20))
    vmem_limit = int(min(max(vmem_limit, 4 << 20), 48 << 20))

    return pl.pallas_call(
        wavernn_seq_kernel,
        out_shape=jax.ShapeDtypeStruct((T_pad, B, H), jnp.float32),
        grid_spec=pltpu.PrefetchScalarGridSpec(
            num_scalar_prefetch=0,
            grid=(batch_shards, Tb),
            in_specs=[
                # initial state: resident per shard
                pl.BlockSpec((Bs, H), lambda s, t: (s, 0)),
                # precomputed input stream: K steps per grid iteration
                pl.BlockSpec((K, Bs, threeH), lambda s, t: (t, s, 0)),
                # fused recurrent weights: DMA'd once, resident in VMEM
                pl.BlockSpec(R.shape, lambda s, t: (0, 0)),
            ],
            out_specs=pl.BlockSpec((K, Bs, H), lambda s, t: (t, s, 0)),
            scratch_shapes=[pltpu.VMEM((Bs, H), jnp.float32)],
        ),
        compiler_params=pltpu.CompilerParams(
            # batch shards -> megacore parallel; timestep axis carries state.
            dimension_semantics=("parallel", "arbitrary"),
            vmem_limit_bytes=vmem_limit,
        ),
    )(ht0, ix_seq, R)


def _run_heads(packed, hs):
    """Batched output MLP over all rows. hs: (rows, H) -> (rows, 2*n_class)."""
    rows, H = hs.shape
    W1, b1, W2, b2 = packed["W1"], packed["b1"], packed["W2"], packed["b2"]
    n2 = W2.shape[1]

    tile_m = 128
    rows_pad = pl.cdiv(rows, tile_m) * tile_m
    if rows_pad != rows:
        hs = jnp.pad(hs, ((0, rows_pad - rows), (0, 0)))

    w_bytes = sum(int(w.size) * w.dtype.itemsize for w in (W1, b1, W2, b2))
    block_bytes = 2 * tile_m * (H + n2) * 4
    vmem_limit = int(min(max(2 * w_bytes + 2 * block_bytes + (2 << 20), 4 << 20),
                         48 << 20))

    p = pl.pallas_call(
        wavernn_head_kernel,
        out_shape=jax.ShapeDtypeStruct((rows_pad, n2), jnp.float32),
        grid_spec=pltpu.PrefetchScalarGridSpec(
            num_scalar_prefetch=0,
            grid=(rows_pad // tile_m,),
            in_specs=[
                pl.BlockSpec((tile_m, H), lambda i: (i, 0)),
                pl.BlockSpec(W1.shape, lambda i: (0, 0)),
                pl.BlockSpec(b1.shape, lambda i: (0, 0)),
                pl.BlockSpec(W2.shape, lambda i: (0, 0)),
                pl.BlockSpec(b2.shape, lambda i: (0, 0)),
            ],
            out_specs=pl.BlockSpec((tile_m, n2), lambda i: (i, 0)),
        ),
        compiler_params=pltpu.CompilerParams(
            dimension_semantics=("parallel",),
            vmem_limit_bytes=vmem_limit,
        ),
    )(hs, W1, b1, W2, b2)
    return p[:rows]


def wavernn_forward_seq(packed, ht0, ct_1_seq, ft_1_seq, ct_seq, *,
                        steps_per_block=8, batch_shards=1):
    """Run T WaveRNN forward steps.

    ht0: (B, H); ct_1_seq/ft_1_seq/ct_seq: (T, B, 1).
    Returns (ht_seq (T,B,H), Pct_seq (T,B,n_class), Pft_seq (T,B,n_class)).
    """
    T, B, _ = ct_1_seq.shape
    H = ht0.shape[1]
    n2 = packed["W2"].shape[1]
    n_class = n2 // 2
    assert B % batch_shards == 0
    K = max(1, min(int(steps_per_block), T))

    # Precompute the input projection (+ folded gate biases) for ALL steps
    # outside the serial kernel: one batched (T*B, 3) @ (3, 3H) matmul.
    Wx, bx = packed["Wx"], packed["bx"]
    xf = jnp.concatenate([ct_1_seq, ft_1_seq, ct_seq], axis=-1)        # (T, B, 3)
    ix = jnp.dot(xf.reshape(T * B, 3).astype(Wx.dtype), Wx)
    ix = (ix.astype(jnp.float32) + bx).reshape(T, B, 3 * H)

    Tb = pl.cdiv(T, K)
    T_pad = Tb * K
    if T_pad != T:
        ix = jnp.pad(ix, ((0, T_pad - T), (0, 0), (0, 0)))

    ht_seq = _run_recurrence(packed, ht0, ix,
                             steps_per_block=K, batch_shards=batch_shards)
    ht_seq = ht_seq[:T]

    # Output heads: fully parallel batched matmul over all T*B rows.
    p = _run_heads(packed, ht_seq.reshape(T * B, H)).reshape(T, B, n2)
    return ht_seq, p[..., :n_class], p[..., n_class:]


def wavernn_forward(packed, ht_1, ct_1, ft_1, ct):
    """Single forward step (original module semantics)."""
    ht_seq, pct_seq, pft_seq = wavernn_forward_seq(
        packed, ht_1, ct_1[None], ft_1[None], ct[None],
        steps_per_block=1, batch_shards=1)
    return ht_seq[0], pct_seq[0], pft_seq[0]


# ----------------------------------------------------------------------------
# Parameters: original (torch-equivalent) layout + kernel repacking
# ----------------------------------------------------------------------------
def make_params(key, hidden_size, n_class):
    """Original-layout parameters (weights stored as in_features x out_features)."""
    Hh = hidden_size // 2
    ks = jax.random.split(key, 11)

    def u(k, shape, fan_in):
        bound = 1.0 / jnp.sqrt(jnp.float32(fan_in))
        return jax.random.uniform(k, shape, jnp.float32, -bound, bound)

    return {
        "Rw":  u(ks[0], (hidden_size, 3 * hidden_size), hidden_size),
        "Icw": u(ks[1], (2, 3 * Hh), 2),
        "Ifw": u(ks[2], (3, 3 * Hh), 3),
        "O1w": u(ks[3], (Hh, Hh), Hh),
        "O1b": u(ks[4], (1, Hh), Hh),
        "O2w": u(ks[5], (Hh, Hh), Hh),
        "O2b": u(ks[6], (1, Hh), Hh),
        "O3w": u(ks[7], (Hh, n_class), Hh),
        "O3b": u(ks[8], (1, n_class), Hh),
        "O4w": u(ks[9], (Hh, n_class), Hh),
        "O4b": u(ks[10], (1, n_class), Hh),
        "bu":  jnp.zeros((1, hidden_size), jnp.float32),
        "br":  jnp.zeros((1, hidden_size), jnp.float32),
        "be":  jnp.zeros((1, hidden_size), jnp.float32),
    }


def pack_params(p, weight_dtype=jnp.float32):
    """Host-side re-layout so the kernels need no concats / sub-lane gathers.

    weight_dtype=jnp.bfloat16 halves VMEM residency / MXU weight feed on
    v6e/v7x (never int8 on v7x: no integer MXU path).
    """
    H = p["Rw"].shape[0]
    Hh = H // 2
    n_class = p["O3w"].shape[1]

    # Fused recurrent weights: Rw columns are already ordered [u | r | e].
    R = p["Rw"]                                                        # (H, 3H)

    # Fused input weights for x = [ct_1, ft_1, ct]: merge Ic/If per gate;
    # the coarse half never sees ct -> zero row; per-gate cols = [coarse|fine].
    Icw3 = jnp.concatenate(
        [p["Icw"], jnp.zeros((1, 3 * Hh), p["Icw"].dtype)], axis=0)    # (3, 3Hh)
    Ifw3 = p["Ifw"]                                                    # (3, 3Hh)

    def gate(g):
        return jnp.concatenate(
            [Icw3[:, g * Hh:(g + 1) * Hh], Ifw3[:, g * Hh:(g + 1) * Hh]], axis=1)

    Wx = jnp.concatenate([gate(0), gate(1), gate(2)], axis=1)          # (3, 3H)
    bx = jnp.concatenate([p["bu"], p["br"], p["be"]], axis=1)          # (1, 3H)

    # Fused output heads (block-diagonal) for the batched head kernel.
    z_hh = jnp.zeros((Hh, Hh), p["O1w"].dtype)
    z_hn = jnp.zeros((Hh, n_class), p["O3w"].dtype)
    W1 = jnp.block([[p["O1w"], z_hh], [z_hh, p["O2w"]]])               # (H, H)
    b1 = jnp.concatenate([p["O1b"], p["O2b"]], axis=1)                 # (1, H)
    W2 = jnp.block([[p["O3w"], z_hn], [z_hn, p["O4w"]]])               # (H, 2n)
    b2 = jnp.concatenate([p["O3b"], p["O4b"]], axis=1)                 # (1, 2n)

    cast = lambda x: x.astype(weight_dtype)
    return {
        "R": cast(R),
        "Wx": cast(Wx), "bx": bx.astype(jnp.float32),
        "W1": cast(W1), "b1": b1.astype(jnp.float32),
        "W2": cast(W2), "b2": b2.astype(jnp.float32),
    }


# ----------------------------------------------------------------------------
# Plain-JAX reference (matches the PyTorch forward exactly, original layout)
# ----------------------------------------------------------------------------
def wavernn_reference_step(p, ht_1, ct_1, ft_1, ct):
    H = ht_1.shape[1]
    Hh = H // 2
    xc = jnp.concatenate([ct_1, ft_1], axis=1)
    xf = jnp.concatenate([ct_1, ft_1, ct], axis=1)
    Rht = ht_1 @ p["Rw"]
    Icxt = xc @ p["Icw"]
    Ifxt = xf @ p["Ifw"]
    Iuxt = jnp.concatenate([Icxt[:, :Hh], Ifxt[:, :Hh]], axis=1)
    Irxt = jnp.concatenate([Icxt[:, Hh:2 * Hh], Ifxt[:, Hh:2 * Hh]], axis=1)
    Iext = jnp.concatenate([Icxt[:, 2 * Hh:], Ifxt[:, 2 * Hh:]], axis=1)
    ut = jax.nn.sigmoid(Rht[:, :H] + Iuxt + p["bu"])
    rt = jax.nn.sigmoid(Rht[:, H:2 * H] + Irxt + p["br"])
    et = jnp.tanh(rt * Rht[:, 2 * H:] + Iext + p["be"])
    ht = ut * ht_1 + (1.0 - ut) * et
    yc, yf = ht[:, :Hh], ht[:, Hh:]
    Pct = jnp.maximum(yc @ p["O1w"] + p["O1b"], 0.0) @ p["O3w"] + p["O3b"]
    Pft = jnp.maximum(yf @ p["O2w"] + p["O2b"], 0.0) @ p["O4w"] + p["O4b"]
    return ht, Pct, Pft


def reference_seq(p, ht0, c1_seq, f1_seq, c_seq):
    ht = ht0
    hs, pcs, pfs = [], [], []
    for t in range(c1_seq.shape[0]):
        ht, pc, pf = wavernn_reference_step(p, ht, c1_seq[t], f1_seq[t], c_seq[t])
        hs.append(ht); pcs.append(pc); pfs.append(pf)
    return jnp.stack(hs), jnp.stack(pcs), jnp.stack(pfs)


# ----------------------------------------------------------------------------
# Demo / correctness check
# ----------------------------------------------------------------------------
if __name__ == "__main__":
    hidden_size = 32      # must be even (coarse/fine halves); 896 in production
    n_class = 16
    seq_len = 8

    key = jax.random.PRNGKey(0)
    keys = jax.random.split(key, 9)
    params = make_params(keys[0], hidden_size, n_class)
    packed = pack_params(params)   # f32 for the tight check; bf16 for v6e/v7x

    # ---- Full sequence: K=4 timesteps per grid block, single shard --------
    batch = 8
    ht0 = jax.random.normal(keys[1], (batch, hidden_size), jnp.float32)
    c1 = jax.random.uniform(keys[2], (seq_len, batch, 1), jnp.float32)
    f1 = jax.random.uniform(keys[3], (seq_len, batch, 1), jnp.float32)
    cc = jax.random.uniform(keys[4], (seq_len, batch, 1), jnp.float32)

    ht_seq, pct_seq, pft_seq = jax.block_until_ready(
        wavernn_forward_seq(packed, ht0, c1, f1, cc,
                            steps_per_block=4, batch_shards=1))
    ht_ref, pct_ref, pft_ref = reference_seq(params, ht0, c1, f1, cc)
    assert jnp.allclose(ht_seq, ht_ref, atol=1e-4, rtol=1e-4)
    assert jnp.allclose(pct_seq, pct_ref, atol=1e-4, rtol=1e-4)
    assert jnp.allclose(pft_seq, pft_ref, atol=1e-4, rtol=1e-4)

    # ---- Single step (original module forward semantics) ------------------
    ht1, pct1, pft1 = jax.block_until_ready(
        wavernn_forward(packed, ht0, c1[0], f1[0], cc[0]))
    assert jnp.allclose(ht1, ht_ref[0], atol=1e-4, rtol=1e-4)
    assert jnp.allclose(pct1, pct_ref[0], atol=1e-4, rtol=1e-4)
    assert jnp.allclose(pft1, pft_ref[0], atol=1e-4, rtol=1e-4)

    # ---- v7x-style megacore path: batch sharded over a "parallel" axis ----
    batch2 = 16
    ht0b = jax.random.normal(keys[5], (batch2, hidden_size), jnp.float32)
    c1b = jax.random.uniform(keys[6], (seq_len, batch2, 1), jnp.float32)
    f1b = jax.random.uniform(keys[7], (seq_len, batch2, 1), jnp.float32)
    ccb = jax.random.uniform(keys[8], (seq_len, batch2, 1), jnp.float32)
    htb, pctb, pftb = jax.block_until_ready(
        wavernn_forward_seq(packed, ht0b, c1b, f1b, ccb,
                            steps_per_block=4, batch_shards=2))
    htb_r, pctb_r, pftb_r = reference_seq(params, ht0b, c1b, f1b, ccb)
    assert jnp.allclose(htb, htb_r, atol=1e-4, rtol=1e-4)
    assert jnp.allclose(pctb, pctb_r, atol=1e-4, rtol=1e-4)
    assert jnp.allclose(pftb, pftb_r, atol=1e-4, rtol=1e-4)

    # ---- bf16 weight packing (v6e/v7x production path): smoke run ---------
    packed_bf16 = pack_params(params, weight_dtype=jnp.bfloat16)
    ht_bf, pct_bf, pft_bf = jax.block_until_ready(
        wavernn_forward_seq(packed_bf16, ht0, c1, f1, cc, steps_per_block=4))
    assert bool(jnp.isfinite(ht_bf).all() & jnp.isfinite(pct_bf).all()
                & jnp.isfinite(pft_bf).all())

    # TODO(synk): generate()'s autoregressive categorical sampling (and the
    # fold_with_overlap / xfade_and_unfold host utilities) feed sampled ct/ft
    # back into the next step; that host-in-the-loop sampling is out of scope
    # for this forward-pass kernel.
    print("KERNEL_OK")
</pallas_src>

<mosaic_0001>
module attributes {stable_mosaic.version = 11 : i64} {
  func.func @wavernn_seq_kernel(%arg0: i32, %arg1: i32, %arg2: memref<8x32xf32, #tpu.memory_space<vmem>>, %arg3: memref<4x8x96xf32, #tpu.memory_space<vmem>>, %arg4: memref<32x96xf32, #tpu.memory_space<vmem>>, %arg5: memref<4x8x32xf32, #tpu.memory_space<vmem>>, %arg6: memref<8x32xf32, #tpu.memory_space<vmem>>) attributes {dimension_semantics = [#tpu.dimension_semantics<parallel>, #tpu.dimension_semantics<arbitrary>], iteration_bounds = array<i64: 1, 2>, scalar_prefetch = 0 : i64, scratch_operands = 1 : i64, tpu.core_type = #tpu.core_type<tc>, window_params = [{transform_indices = @transform_0, window_bounds = array<i64: 8, 32>}, {transform_indices = @transform_1, window_bounds = array<i64: 4, 8, 96>}, {pipeline_mode = #tpu.pipeline_mode<synchronous>, transform_indices = @transform_2, window_bounds = array<i64: 32, 96>}, {transform_indices = @transform_3, window_bounds = array<i64: 4, 8, 32>}]} {
    %c0_i32 = arith.constant 0 : i32
    %0 = arith.cmpi eq, %arg1, %c0_i32 : i32
    %1 = arith.extui %0 : i1 to i32
    %c0_i32_0 = arith.constant 0 : i32
    %2 = arith.cmpi ne, %1, %c0_i32_0 : i32
    scf.if %2 {
      %c0_44 = arith.constant 0 : index
      %c0_45 = arith.constant 0 : index
      %129 = vector.load %arg2[%c0_44, %c0_45] : memref<8x32xf32, #tpu.memory_space<vmem>>, vector<8x32xf32>
      %c0_46 = arith.constant 0 : index
      %c0_47 = arith.constant 0 : index
      %130 = vector.load %arg6[%c0_46, %c0_47] : memref<8x32xf32, #tpu.memory_space<vmem>>, vector<8x32xf32>
      tpu.vector_store %arg6[%c0_46, %c0_47], %129 {strides = array<i32>} : memref<8x32xf32, #tpu.memory_space<vmem>>, vector<8x32xf32>,
    } else {
    }
    %c0 = arith.constant 0 : index
    %c0_1 = arith.constant 0 : index
    %3 = vector.load %arg6[%c0, %c0_1] : memref<8x32xf32, #tpu.memory_space<vmem>>, vector<8x32xf32>
    %c0_2 = arith.constant 0 : index
    %c0_3 = arith.constant 0 : index
    %4 = vector.load %arg4[%c0_2, %c0_3] : memref<32x96xf32, #tpu.memory_space<vmem>>, vector<32x96xf32>
    %cst = arith.constant dense<0.000000e+00> : vector<8x96xf32>
    %5 = tpu.matmul %3, %4, %cst {dimension_numbers = #tpu.dot_dimension_numbers<[1], [0], [0], [1], [0, 0, 1, 1], [], []>} : vector<8x32xf32>, vector<32x96xf32>, vector<8x96xf32> -> vector<8x96xf32>
    %c0_4 = arith.constant 0 : index
    %c0_5 = arith.constant 0 : index
    %c0_6 = arith.constant 0 : index
    %6 = vector.load %arg3[%c0_4, %c0_5, %c0_6] : memref<4x8x96xf32, #tpu.memory_space<vmem>>, vector<1x8x96xf32>
    %7 = vector.shape_cast %6 : vector<1x8x96xf32> to vector<8x96xf32>
    %8 = vector.extract_strided_slice %5 {offsets = [0, 0], sizes = [8, 32], strides = [1, 1]} : vector<8x96xf32> to vector<8x32xf32>
    %9 = vector.extract_strided_slice %7 {offsets = [0, 0], sizes = [8, 32], strides = [1, 1]} : vector<8x96xf32> to vector<8x32xf32>
    %10 = arith.addf %8, %9 : vector<8x32xf32>
    %11 = arith.negf %10 : vector<8x32xf32>
    %12 = math.exp %11 : vector<8x32xf32>
    %cst_7 = arith.constant 1.000000e+00 : f32
    %13 = vector.broadcast %cst_7 : f32 to vector<8x32xf32>
    %14 = arith.addf %13, %12 : vector<8x32xf32>
    %15 = arith.divf %13, %14 : vector<8x32xf32>
    %16 = vector.extract_strided_slice %5 {offsets = [0, 32], sizes = [8, 32], strides = [1, 1]} : vector<8x96xf32> to vector<8x32xf32>
    %17 = vector.extract_strided_slice %7 {offsets = [0, 32], sizes = [8, 32], strides = [1, 1]} : vector<8x96xf32> to vector<8x32xf32>
    %18 = arith.addf %16, %17 : vector<8x32xf32>
    %19 = arith.negf %18 : vector<8x32xf32>
    %20 = math.exp %19 : vector<8x32xf32>
    %cst_8 = arith.constant 1.000000e+00 : f32
    %21 = vector.broadcast %cst_8 : f32 to vector<8x32xf32>
    %22 = arith.addf %21, %20 : vector<8x32xf32>
    %23 = arith.divf %21, %22 : vector<8x32xf32>
    %24 = vector.extract_strided_slice %5 {offsets = [0, 64], sizes = [8, 32], strides = [1, 1]} : vector<8x96xf32> to vector<8x32xf32>
    %25 = arith.mulf %23, %24 : vector<8x32xf32>
    %26 = vector.extract_strided_slice %7 {offsets = [0, 64], sizes = [8, 32], strides = [1, 1]} : vector<8x96xf32> to vector<8x32xf32>
    %27 = arith.addf %25, %26 : vector<8x32xf32>
    %28 = math.tanh %27 : vector<8x32xf32>
    %29 = arith.subf %3, %28 : vector<8x32xf32>
    %30 = arith.mulf %15, %29 : vector<8x32xf32>
    %31 = arith.addf %28, %30 : vector<8x32xf32>
    %c0_9 = arith.constant 0 : index
    %c0_10 = arith.constant 0 : index
    %c0_11 = arith.constant 0 : index
    %32 = vector.load %arg5[%c0_9, %c0_10, %c0_11] : memref<4x8x32xf32, #tpu.memory_space<vmem>>, vector<1x8x32xf32>
    %33 = vector.shape_cast %32 : vector<1x8x32xf32> to vector<8x32xf32>
    %34 = vector.shape_cast %31 : vector<8x32xf32> to vector<1x8x32xf32>
    tpu.vector_store %arg5[%c0_9, %c0_10, %c0_11], %34 {strides = array<i32>} : memref<4x8x32xf32, #tpu.memory_space<vmem>>, vector<1x8x32xf32>,
    %c0_12 = arith.constant 0 : index
    %c0_13 = arith.constant 0 : index
    %35 = vector.load %arg4[%c0_12, %c0_13] : memref<32x96xf32, #tpu.memory_space<vmem>>, vector<32x96xf32>
    %cst_14 = arith.constant dense<0.000000e+00> : vector<8x96xf32>
    %36 = tpu.matmul %31, %35, %cst_14 {dimension_numbers = #tpu.dot_dimension_numbers<[1], [0], [0], [1], [0, 0, 1, 1], [], []>} : vector<8x32xf32>, vector<32x96xf32>, vector<8x96xf32> -> vector<8x96xf32>
    %c1 = arith.constant 1 : index
    %c0_15 = arith.constant 0 : index
    %c0_16 = arith.constant 0 : index
    %37 = vector.load %arg3[%c1, %c0_15, %c0_16] : memref<4x8x96xf32, #tpu.memory_space<vmem>>, vector<1x8x96xf32>
    %38 = vector.shape_cast %37 : vector<1x8x96xf32> to vector<8x96xf32>
    %39 = vector.extract_strided_slice %36 {offsets = [0, 0], sizes = [8, 32], strides = [1, 1]} : vector<8x96xf32> to vector<8x32xf32>
    %40 = vector.extract_strided_slice %38 {offsets = [0, 0], sizes = [8, 32], strides = [1, 1]} : vector<8x96xf32> to vector<8x32xf32>
    %41 = arith.addf %39, %40 : vector<8x32xf32>
    %42 = arith.negf %41 : vector<8x32xf32>
    %43 = math.exp %42 : vector<8x32xf32>
    %cst_17 = arith.constant 1.000000e+00 : f32
    %44 = vector.broadcast %cst_17 : f32 to vector<8x32xf32>
    %45 = arith.addf %44, %43 : vector<8x32xf32>
    %46 = arith.divf %44, %45 : vector<8x32xf32>
    %47 = vector.extract_strided_slice %36 {offsets = [0, 32], sizes = [8, 32], strides = [1, 1]} : vector<8x96xf32> to vector<8x32xf32>
    %48 = vector.extract_strided_slice %38 {offsets = [0, 32], sizes = [8, 32], strides = [1, 1]} : vector<8x96xf32> to vector<8x32xf32>
    %49 = arith.addf %47, %48 : vector<8x32xf32>
    %50 = arith.negf %49 : vector<8x32xf32>
    %51 = math.exp %50 : vector<8x32xf32>
    %cst_18 = arith.constant 1.000000e+00 : f32
    %52 = vector.broadcast %cst_18 : f32 to vector<8x32xf32>
    %53 = arith.addf %52, %51 : vector<8x32xf32>
    %54 = arith.divf %52, %53 : vector<8x32xf32>
    %55 = vector.extract_strided_slice %36 {offsets = [0, 64], sizes = [8, 32], strides = [1, 1]} : vector<8x96xf32> to vector<8x32xf32>
    %56 = arith.mulf %54, %55 : vector<8x32xf32>
    %57 = vector.extract_strided_slice %38 {offsets = [0, 64], sizes = [8, 32], strides = [1, 1]} : vector<8x96xf32> to vector<8x32xf32>
    %58 = arith.addf %56, %57 : vector<8x32xf32>
    %59 = math.tanh %58 : vector<8x32xf32>
    %60 = arith.subf %31, %59 : vector<8x32xf32>
    %61 = arith.mulf %46, %60 : vector<8x32xf32>
    %62 = arith.addf %59, %61 : vector<8x32xf32>
    %c1_19 = arith.constant 1 : index
    %c0_20 = arith.constant 0 : index
    %c0_21 = arith.constant 0 : index
    %63 = vector.load %arg5[%c1_19, %c0_20, %c0_21] : memref<4x8x32xf32, #tpu.memory_space<vmem>>, vector<1x8x32xf32>
    %64 = vector.shape_cast %63 : vector<1x8x32xf32> to vector<8x32xf32>
    %65 = vector.shape_cast %62 : vector<8x32xf32> to vector<1x8x32xf32>
    tpu.vector_store %arg5[%c1_19, %c0_20, %c0_21], %65 {strides = array<i32>} : memref<4x8x32xf32, #tpu.memory_space<vmem>>, vector<1x8x32xf32>,
    %c0_22 = arith.constant 0 : index
    %c0_23 = arith.constant 0 : index
    %66 = vector.load %arg4[%c0_22, %c0_23] : memref<32x96xf32, #tpu.memory_space<vmem>>, vector<32x96xf32>
    %cst_24 = arith.constant dense<0.000000e+00> : vector<8x96xf32>
    %67 = tpu.matmul %62, %66, %cst_24 {dimension_numbers = #tpu.dot_dimension_numbers<[1], [0], [0], [1], [0, 0, 1, 1], [], []>} : vector<8x32xf32>, vector<32x96xf32>, vector<8x96xf32> -> vector<8x96xf32>
    %c2 = arith.constant 2 : index
    %c0_25 = arith.constant 0 : index
    %c0_26 = arith.constant 0 : index
    %68 = vector.load %arg3[%c2, %c0_25, %c0_26] : memref<4x8x96xf32, #tpu.memory_space<vmem>>, vector<1x8x96xf32>
    %69 = vector.shape_cast %68 : vector<1x8x96xf32> to vector<8x96xf32>
    %70 = vector.extract_strided_slice %67 {offsets = [0, 0], sizes = [8, 32], strides = [1, 1]} : vector<8x96xf32> to vector<8x32xf32>
    %71 = vector.extract_strided_slice %69 {offsets = [0, 0], sizes = [8, 32], strides = [1, 1]} : vector<8x96xf32> to vector<8x32xf32>
    %72 = arith.addf %70, %71 : vector<8x32xf32>
    %73 = arith.negf %72 : vector<8x32xf32>
    %74 = math.exp %73 : vector<8x32xf32>
    %cst_27 = arith.constant 1.000000e+00 : f32
    %75 = vector.broadcast %cst_27 : f32 to vector<8x32xf32>
    %76 = arith.addf %75, %74 : vector<8x32xf32>
    %77 = arith.divf %75, %76 : vector<8x32xf32>
    %78 = vector.extract_strided_slice %67 {offsets = [0, 32], sizes = [8, 32], strides = [1, 1]} : vector<8x96xf32> to vector<8x32xf32>
    %79 = vector.extract_strided_slice %69 {offsets = [0, 32], sizes = [8, 32], strides = [1, 1]} : vector<8x96xf32> to vector<8x32xf32>
    %80 = arith.addf %78, %79 : vector<8x32xf32>
    %81 = arith.negf %80 : vector<8x32xf32>
    %82 = math.exp %81 : vector<8x32xf32>
    %cst_28 = arith.constant 1.000000e+00 : f32
    %83 = vector.broadcast %cst_28 : f32 to vector<8x32xf32>
    %84 = arith.addf %83, %82 : vector<8x32xf32>
    %85 = arith.divf %83, %84 : vector<8x32xf32>
    %86 = vector.extract_strided_slice %67 {offsets = [0, 64], sizes = [8, 32], strides = [1, 1]} : vector<8x96xf32> to vector<8x32xf32>
    %87 = arith.mulf %85, %86 : vector<8x32xf32>
    %88 = vector.extract_strided_slice %69 {offsets = [0, 64], sizes = [8, 32], strides = [1, 1]} : vector<8x96xf32> to vector<8x32xf32>
    %89 = arith.addf %87, %88 : vector<8x32xf32>
    %90 = math.tanh %89 : vector<8x32xf32>
    %91 = arith.subf %62, %90 : vector<8x32xf32>
    %92 = arith.mulf %77, %91 : vector<8x32xf32>
    %93 = arith.addf %90, %92 : vector<8x32xf32>
    %c2_29 = arith.constant 2 : index
    %c0_30 = arith.constant 0 : index
    %c0_31 = arith.constant 0 : index
    %94 = vector.load %arg5[%c2_29, %c0_30, %c0_31] : memref<4x8x32xf32, #tpu.memory_space<vmem>>, vector<1x8x32xf32>
    %95 = vector.shape_cast %94 : vector<1x8x32xf32> to vector<8x32xf32>
    %96 = vector.shape_cast %93 : vector<8x32xf32> to vector<1x8x32xf32>
    tpu.vector_store %arg5[%c2_29, %c0_30, %c0_31], %96 {strides = array<i32>} : memref<4x8x32xf32, #tpu.memory_space<vmem>>, vector<1x8x32xf32>,
    %c0_32 = arith.constant 0 : index
    %c0_33 = arith.constant 0 : index
    %97 = vector.load %arg4[%c0_32, %c0_33] : memref<32x96xf32, #tpu.memory_space<vmem>>, vector<32x96xf32>
    %cst_34 = arith.constant dense<0.000000e+00> : vector<8x96xf32>
    %98 = tpu.matmul %93, %97, %cst_34 {dimension_numbers = #tpu.dot_dimension_numbers<[1], [0], [0], [1], [0, 0, 1, 1], [], []>} : vector<8x32xf32>, vector<32x96xf32>, vector<8x96xf32> -> vector<8x96xf32>
    %c3 = arith.constant 3 : index
    %c0_35 = arith.constant 0 : index
    %c0_36 = arith.constant 0 : index
    %99 = vector.load %arg3[%c3, %c0_35, %c0_36] : memref<4x8x96xf32, #tpu.memory_space<vmem>>, vector<1x8x96xf32>
    %100 = vector.shape_cast %99 : vector<1x8x96xf32> to vector<8x96xf32>
    %101 = vector.extract_strided_slice %98 {offsets = [0, 0], sizes = [8, 32], strides = [1, 1]} : vector<8x96xf32> to vector<8x32xf32>
    %102 = vector.extract_strided_slice %100 {offsets = [0, 0], sizes = [8, 32], strides = [1, 1]} : vector<8x96xf32> to vector<8x32xf32>
    %103 = arith.addf %101, %102 : vector<8x32xf32>
    %104 = arith.negf %103 : vector<8x32xf32>
    %105 = math.exp %104 : vector<8x32xf32>
    %cst_37 = arith.constant 1.000000e+00 : f32
    %106 = vector.broadcast %cst_37 : f32 to vector<8x32xf32>
    %107 = arith.addf %106, %105 : vector<8x32xf32>
    %108 = arith.divf %106, %107 : vector<8x32xf32>
    %109 = vector.extract_strided_slice %98 {offsets = [0, 32], sizes = [8, 32], strides = [1, 1]} : vector<8x96xf32> to vector<8x32xf32>
    %110 = vector.extract_strided_slice %100 {offsets = [0, 32], sizes = [8, 32], strides = [1, 1]} : vector<8x96xf32> to vector<8x32xf32>
    %111 = arith.addf %109, %110 : vector<8x32xf32>
    %112 = arith.negf %111 : vector<8x32xf32>
    %113 = math.exp %112 : vector<8x32xf32>
    %cst_38 = arith.constant 1.000000e+00 : f32
    %114 = vector.broadcast %cst_38 : f32 to vector<8x32xf32>
    %115 = arith.addf %114, %113 : vector<8x32xf32>
    %116 = arith.divf %114, %115 : vector<8x32xf32>
    %117 = vector.extract_strided_slice %98 {offsets = [0, 64], sizes = [8, 32], strides = [1, 1]} : vector<8x96xf32> to vector<8x32xf32>
    %118 = arith.mulf %116, %117 : vector<8x32xf32>
    %119 = vector.extract_strided_slice %100 {offsets = [0, 64], sizes = [8, 32], strides = [1, 1]} : vector<8x96xf32> to vector<8x32xf32>
    %120 = arith.addf %118, %119 : vector<8x32xf32>
    %121 = math.tanh %120 : vector<8x32xf32>
    %122 = arith.subf %93, %121 : vector<8x32xf32>
    %123 = arith.mulf %108, %122 : vector<8x32xf32>
    %124 = arith.addf %121, %123 : vector<8x32xf32>
    %c3_39 = arith.constant 3 : index
    %c0_40 = arith.constant 0 : index
    %c0_41 = arith.constant 0 : index
    %125 = vector.load %arg5[%c3_39, %c0_40, %c0_41] : memref<4x8x32xf32, #tpu.memory_space<vmem>>, vector<1x8x32xf32>
    %126 = vector.shape_cast %125 : vector<1x8x32xf32> to vector<8x32xf32>
    %127 = vector.shape_cast %124 : vector<8x32xf32> to vector<1x8x32xf32>
    tpu.vector_store %arg5[%c3_39, %c0_40, %c0_41], %127 {strides = array<i32>} : memref<4x8x32xf32, #tpu.memory_space<vmem>>, vector<1x8x32xf32>,
    %c0_42 = arith.constant 0 : index
    %c0_43 = arith.constant 0 : index
    %128 = vector.load %arg6[%c0_42, %c0_43] : memref<8x32xf32, #tpu.memory_space<vmem>>, vector<8x32xf32>
    tpu.vector_store %arg6[%c0_42, %c0_43], %124 {strides = array<i32>} : memref<8x32xf32, #tpu.memory_space<vmem>>, vector<8x32xf32>,
    return
  }
  func.func @transform_0(%arg0: i32, %arg1: i32) -> (i32, i32) {
    %c0_i32 = arith.constant 0 : i32
    %c0_i32_0 = arith.constant 0 : i32
    return %arg0, %c0_i32 : i32, i32
  }
  func.func @transform_1(%arg0: i32, %arg1: i32) -> (i32, i32, i32) {
    %c0_i32 = arith.constant 0 : i32
    %c0_i32_0 = arith.constant 0 : i32
    return %arg1, %arg0, %c0_i32 : i32, i32, i32
  }
  func.func @transform_2(%arg0: i32, %arg1: i32) -> (i32, i32) {
    %c0_i32 = arith.constant 0 : i32
    %c0_i32_0 = arith.constant 0 : i32
    %c0_i32_1 = arith.constant 0 : i32
    return %c0_i32, %c0_i32_0 : i32, i32
  }
  func.func @transform_3(%arg0: i32, %arg1: i32) -> (i32, i32, i32) {
    %c0_i32 = arith.constant 0 : i32
    %c0_i32_0 = arith.constant 0 : i32
    return %arg1, %arg0, %c0_i32 : i32, i32, i32
  }
}

</mosaic_0001>

<bundles_post_ra>
// kernel: tpu_custom_call.1
= control target key start
LH: loop header
LB: loop body
LE: loop exit
PB: predicated region body
PF: predicated region fallthrough
CT: control target
= control target key end

     0   :  { %s1249_s0 = inlined_call_operand.hbm [shape: f32[8,32], index: 0, kind: input, shape index: {}]   ;;  %s1250_s1 = inlined_call_operand.hbm [shape: f32[8,8,96], index: 1, kind: input, shape index: {}]   ;;  %s1251_s2 = inlined_call_operand.hbm [shape: f32[32,96], index: 2, kind: input, shape index: {}]   ;;  %s1252_s3 = inlined_call_operand.hbm [shape: f32[8,8,32], index: 3, kind: output, shape index: {}]  }
   0x1   :  { %1255 = sst [smem:[#allocation14_spill]] %s1249_s0 }
   0x2   :  { %8 = vsyncpa [#allocation4], 0 }
   0x3   :  { %9 = vsyncpa [#allocation7], 0 }
   0x4   :  { %11 = vsyncpa [#allocation7 + $0x1], 0 }
   0x5   :  { %12 = vsyncpa [#allocation5], 0 }
   0x6   :  { %14 = vsyncpa [#allocation5 + $0x1], 0  ;;  %s1045_s12 = smov 0   ;;  %s1047_s13 = smov 0  }
   0x7   :  { %s1049_s14 = smov 0   ;;  %s1051_s15 = smov 0  }
   0x8   :  { %s1053_s16 = smov 0   ;;  %s1055_s17 = smov 0  }
   0x9 LB: > { %s1076_s18 = sadd.s32 4294967295, %s1015_s17   ;;  %s687_s19 = sadd.s32 4294967294, %s1015_s17   ;;  %s1015_s17 = sphi %s1055_s17, %s20_s17   ;;  %s1011_s16 = sphi %s1053_s16, %s1268_s16   ;;  %s1007_s15 = sphi %s1051_s15, %s1267_s15   ;;  %s1003_s14 = sphi %s1049_s14, %s1266_s14   ;;  %s999_s13 = sphi %s1047_s13, %s1265_s13   ;;  %s995_s12 = sphi %s1045_s12, %s1264_s12  }
   0xa   : > { %p80_p0 = scmp.ne.s32.totalorder %s999_s13, %s995_s12  ;;  %p81_p1 = scmp.eq.s32.totalorder %s1076_s18, 0 }
   0xb   : > { %p127_p2 = scmp.eq.s32.totalorder %s1076_s18, 1  ;;  %p133_p3 = scmp.eq.s32.totalorder %s687_s19, 1 }
   0xc   : > { %p1085_p4 = por %p81_p1, %p80_p0  ;;  %p688_p5 = scmp.ge.s32.totalorder %s1015_s17, 1 }
   0xd   : > { %p1090_p6 = por %p133_p3, %p80_p0  ;;  %p140_p7 = scmp.lt.s32.totalorder %s1015_s17, 3 }
   0xe   : > { %s165_s24 = sshll.u32 %s1251_s2, 4  ;;  %s1017_s26 = smov [#allocation8]   ;;  %s166_s24 = int_to_ptr.hbm [resolvable:$true] %s165_s24 }
   0xf   : > { %p1098_p8 = pnand %p688_p5, %p140_p7  ;;  %s167_s27 = sshll.u32 %s1017_s26, 4  ;;  %s168_s27 = int_to_ptr.vmem [resolvable:$true] %s167_s27 }
  0x10   : > { %p691_p11 = scmp.ge.s32.totalorder %s1015_s17, 2  ;;  %s1259_s0 = sld [smem:[#allocation14_spill]] }
  0x11   : > { %p734_p9 = pneg %p1098_p8  ;;  %s1253_s4 = smov 128  }
  0x12   : > { %s1254_s5 = smov 8   ;;  %s1020_s6 = smov [#allocation3]  }
  0x13   : > { %p735_p10 = pnand %p734_p9, %p81_p1  ;;  %s156_s7 = sshll.u32 %s1020_s6, 4  ;;  %s157_s7 = int_to_ptr.vmem [resolvable:$true] %s156_s7 }
  0x14   : > { %s29_s8 = sadd.s32 1, %s1011_s16  ;;  %s67_s9 = sadd.s32 1, %s1003_s14 }
  0x15   : > { %740 = dma.hbm_to_vmem [thread:$0]  (!%p735_p10), %s166_s24, 512, %s168_s27, [#allocation7], %s1253_s4, %s1253_s4, %s1254_s5  }
  0x16   : > { %s154_s30 = sshll.u32 %s1259_s0, 4  ;;  %p30_p12 = scmp.ge.s32.totalorder %s29_s8, 2  ;;  %s155_s30 = int_to_ptr.hbm [resolvable:$true] %s154_s30 }
  0x17   : > { %737 = dma.hbm_to_vmem [thread:$0]  (!%p735_p10), %s155_s30, 128, %s157_s7, [#allocation4]  }
  0x18   : > { %p74_p13 = scmp.ne.s32.totalorder %s1003_s14, %s999_s13  ;;  %p75_p0 = scmp.eq.s32.totalorder %s1015_s17, 0 }
  0x19   : > { %p751_p3 = scmp.lt.s32.totalorder %s1015_s17, 2  ;;  %s1270_s8 = smov (%p30_p12, %s29_s8), 0 }
  0x1a   : > { %p1121_p5 = por %p75_p0, %p74_p13  ;;  %p1127_p7 = por %p127_p2, %p74_p13 }
  0x1b   : > { %s62_s19 = ssub.s32 %s1011_s16, %s1270_s8  ;;  %s181_s22 = sand.u32 1, %s1015_s17  }
  0x1c   : > { %p65_p9 = scmp.eq.s32.totalorder %s62_s19, 0  ;;  %s183_s23 = sand.u32 1, %s1003_s14  }
  0x1d   : > { %s720_s24 = sshll.u32 %s1011_s16, 5  ;;  %s692_s27 = sshll.u32 %s183_s23, 5 }
  0x1e   : > { %s1137_s26 = scalar_select %p65_p9, %s1003_s14, %s67_s9  }
  0x1f   : > { %s191_s30 = scalar_lea.hbm %s1250_s1, %s720_s24  ;;  %s185_s7 = scalar_lea.vmem [#allocation6], %s692_s27 }
  0x20   : > { %s192_s6 = sshll.u32 %s191_s30, 4  ;;  %s194_s4 = sshll.u32 %s185_s7, 4  ;;  %s193_s6 = int_to_ptr.hbm [resolvable:$true] %s192_s6  ;;  %s195_s4 = int_to_ptr.vmem [resolvable:$true] %s194_s4 }
  0x21   : > { %p742_p2 = pnand %p751_p3, %p1121_p5  ;;  %s182_s5 = scalar_lea.sflag [#allocation7], %s181_s22 }
  0x22   : > { %s1262_s0 = smov 8   ;;  %s1263_s19 = smov 128  }
  0x23   : > { %744 = dma.hbm_to_vmem [thread:$0]  (!%p742_p2), %s193_s6, 512, %s195_s4, %s182_s5, %s1263_s19, %s1263_s19, %s1262_s0  }
  0x24   : > { %206 = sbr.rel (%p1098_p8) target bundleno = 2380 (0x94c), region = 32 }
  0x29   : > { %978 = dma.done.wait (%p81_p1), [#allocation4], 128  }
  0x2a   : > { %980 = vsyncadd (%p81_p1), [#allocation4], 4294967168  ;;  %s213_s9 = sand.u32 1, %s1076_s18   ;;  %s215_s10 = sand.u32 1, %s999_s13  }
  0x2b   : > { %s697_s22 = sshll.u32 %s215_s10, 5  ;;  %s214_s23 = scalar_lea.sflag [#allocation7], %s213_s9 }
  0x2c   : > { %s1159_s24 = scalar_lea.vmem [#allocation6], %s697_s22 }
  0x2d   : > { %982 = dma.done.wait (%p1085_p4), %s214_s23, 512  }
  0x2e   : > { %984 = vsyncadd (%p1085_p4), %s214_s23, 4294966784 }
  0x2f   : > { %986 = dma.done.wait (%p81_p1), [#allocation7], 512  }
  0x30   : > { %988 = vsyncadd (%p81_p1), [#allocation7], 4294966784  ;;  %s1169_s0 = scalar_lea.vmem [#allocation9], %s697_s22  ;;  %p700_p8 = scmp.ne.s32.totalorder %s1007_s15, 0 }
  0x32   : > { %251 = sbr.rel (%p700_p8) target bundleno = 57 (0x39), region = 48 }
  0x37   : > { %v252_v0 = vld [vmem:[#allocation3] sm:$0xff]  ;;  %vm253_vm0 = vcmask 261120  }
  0x38   : > { %254 = vst.msk [vmem:[#allocation2] sm:$0xff] %vm253_vm0, %v252_v0 }
  0x39 PF: > { %v259_v1 = vld [vmem:[#allocation8 + $0x18] sm:$0xff]  ;;  %v258_v2 = vld [vmem:[#allocation8 + $0x10] sm:$0xff]  ;;  %v257_v3 = vld [vmem:[#allocation8 + $0x8] sm:$0xff]  ;;  %vm260_vm1 = vcmask 261120   ;;  %s1021_s18 = smov 96   ;;  %s1022_s20 = smov 32  }
  0x3a   : > { %276 = vmatpush.msra.mxu0 %v259_v1  ;;  %350 = vmatpush.msra.mxu1 %v259_v1  ;;  %v256_v4 = vld [vmem:[#allocation8] sm:$0xff]  ;;  %v704_v32 = vld [vmem:[%s1159_s24 + $0x8] sm:$0xff]  ;;  %v708_v60 = vld [vmem:[%s1159_s24 + $0x10] sm:$0xff]  ;;  %s721_s25 = sshll.u32 %s1007_s15, 5  ;;  %s575_s28 = sshll.u32 %s1169_s0, 4  ;;  %s576_s28 = int_to_ptr.vmem [resolvable:$true] %s575_s28 }
  0x3b   : > { %426 = vmatpush.msra.mxu2 %v259_v1  ;;  %502 = vmatpush.msra.mxu3 %v259_v1  ;;  %v284_v6 = vld [vmem:[%s1159_s24] sm:$0xff]  ;;  %s574_s27 = scalar_lea.hbm %s1252_s3, %s721_s25  ;;  %s562_s30 = scalar_lea.sflag [#allocation5], %s215_s10 }
  0x3c   : > { %277 = vmatpush.msra.mxu0 %v258_v2  ;;  %351 = vmatpush.msra.mxu1 %v258_v2  ;;  %s577_s29 = sshll.u32 %s574_s27, 4  ;;  %s945_s9 = scalar_lea.hbm %s1252_s3, 64  ;;  %s578_s29 = int_to_ptr.hbm [resolvable:$true] %s577_s29 }
  0x3d   : > { %427 = vmatpush.msra.mxu2 %v258_v2  ;;  %503 = vmatpush.msra.mxu3 %v258_v2  ;;  %s939_s6 = sshra.s32 %s578_s29, 4  ;;  %s940_s6 = int_to_ptr.hbm [resolvable:$true] %s939_s6 }
  0x3e   : > { %278 = vmatpush.msra.mxu0 %v257_v3  ;;  %352 = vmatpush.msra.mxu1 %v257_v3  ;;  %s941_s7 = scalar_lea.hbm %s940_s6, 32  ;;  %p946_p12 = scmp.lt.s32.totalorder %s940_s6, %s1252_s3 }
  0x3f   : > { %v255_v5 = vld [vmem:[#allocation2] sm:$0xff]  ;;  %428 = vmatpush.msra.mxu2 %v257_v3  ;;  %504 = vmatpush.msra.mxu3 %v257_v3  ;;  %p942_p1 = scmp.ne.s32.totalorder %s940_s6, %s941_s7  ;;  %p947_p13 = scmp.lt.s32.totalorder %s945_s9, %s941_s7 }
  0x40   : > { %279 = vmatpush.msra.mxu0 %v256_v4  ;;  %353 = vmatpush.msra.mxu1 %v256_v4 }
  0x41   : > { %701 = vmatmul.msk.f32.vlgmr.msra.gmra.mxu0 %vm260_vm1, %v255_v5  ;;  %429 = vmatpush.msra.mxu2 %v256_v4  ;;  %p943_p4 = pnand %p942_p1, %p1127_p7  ;;  %p948_p0 = por %p947_p13, %p946_p12 }
  0x42   : > { %505 = vmatpush.msra.mxu3 %v256_v4 }
  0x43   : > { %p944_p10 = pneg %p943_p4 }
  0x45   : > { %p949_p3 = pnand %p948_p0, %p944_p10 }
  0xbe   : > { %v281_v7 = vpop.f32.mrf.mxu0 }
  0xbf   : > { %v285_v8 = vadd.f32 %v284_v6, %v281_v7  ;;  %306 = vrot.lane.b32.xlu0 %v281_v7, %s1021_s18 }
  0xc1   : > { %v702_v9 = vmul.f32 -1.442695, %v285_v8 }
  0xc3   : > { %811 = vpow2.f32 %v702_v9 }
  0xc7   : > { %311 = vrot.lane.b32.xlu0 %v284_v6, %s1021_s18 }
  0xc9   : > { %v812_v10 = vpop.eup %811 }
  0xca   : > { %v289_v11 = vadd.f32 1.0, %v812_v10 }
  0xcc   : > { %813 = vrcp.f32 %v289_v11  ;;  %v301_v18 = vand.u32 2147483648, %v289_v11  ;;  %vm295_vm3 = vweird.f32 %v289_v11  ;;  %v299_v19 = vand.u32 2147483647, %v289_v11 }
  0xce   : > { %v302_v21 = vor.u32 1.1754944e-38, %v301_v18  ;;  %vm300_vm5 = vcmp.eq.f32.partialorder %v299_v19, 8.507059e+37 }
  0xcf   : > { %386 = vrot.lane.b32.xlu0 %v704_v32, %s1021_s18 }
  0xd2   : > { %v814_v12 = vpop.eup %813 }
  0xd3   : > { %v291_v13 = vmul.f32 %v814_v12, %v289_v11  ;;  %vm296_vm2 = vweird.f32 %v814_v12 }
  0xd4   : > { %vm297_vm4 = vmor %vm295_vm3, %vm296_vm2 }
  0xd5   : > { %v292_v14 = vsub.f32 1.0, %v291_v13 }
  0xd7   : > { %v293_v15 = vmul.f32 %v814_v12, %v292_v14 }
  0xd9   : > { %v294_v16 = vadd.f32 %v814_v12, %v293_v15 }
  0xdb   : > { %v298_v20 = vsel %vm297_vm4, %v814_v12, %v294_v16 }
  0xdc   : > { %v303_v22 = vsel %vm300_vm5, %v302_v21, %v298_v20 }
 0x131   : > { %v307_v17 = vpop.permute.xlu0 %306 }
 0x132   : > { %v309_v23 = vmul.f32 %v307_v17, %v303_v22 }
 0x139   : > { %v312_v24 = vpop.permute.xlu0 %311 }
 0x13a   : > { %v314_v25 = vadd.f32 %v312_v24, %v309_v23  ;;  %v712_v23 = vld [vmem:[%s1159_s24 + $0x18] sm:$0xff] }
 0x13c   : > { %815 = vtanh.f32 %v314_v25 }
 0x141   : > { %v387_v50 = vpop.permute.xlu0 %386 }
 0x142   : > { %v816_v26 = vpop.eup %815 }
 0x143   : > { %317 = vrot.lane.b32.xlu1 %v816_v26, %s1021_s18 }
 0x1b5   : > { %v318_v27 = vpop.permute.xlu1 %317 }
 0x1b6   : > { %v320_v28 = vsub.f32 %v255_v5, %v318_v27 }
 0x1b8   : > { %v321_v29 = vmul.f32 %v320_v28, %v303_v22 }
 0x1ba   : > { %323 = vrot.lane.b32.xlu1 %v321_v29, %s1022_s20 }
 0x22c   : > { %v324_v30 = vpop.permute.xlu1 %323 }
 0x22d   : > { %v326_v31 = vadd.f32 %v816_v26, %v324_v30 }
 0x22f   : > { %328 = vrot.lane.b32.xlu2 %v326_v31, %s1021_s18 }
 0x289   : > { %v329_v33 = vpop.permute.xlu2 %328 }
 0x28a   : > { %331 = vst.msk [vmem:[%s1169_s0] sm:$0xff] %vm260_vm1, %v329_v33  ;;  %703 = vmatmul.msk.f32.vlgmr.msra.gmra.mxu1 %vm260_vm1, %v329_v33 }
 0x307   : > { %v355_v34 = vpop.f32.mrf.mxu1 }
 0x308   : > { %381 = vrot.lane.b32.xlu2 %v355_v34, %s1021_s18  ;;  %v360_v35 = vadd.f32 %v704_v32, %v355_v34 }
 0x30a   : > { %v705_v36 = vmul.f32 -1.442695, %v360_v35 }
 0x30c   : > { %817 = vpow2.f32 %v705_v36 }
 0x312   : > { %v818_v37 = vpop.eup %817 }
 0x313   : > { %v364_v38 = vadd.f32 1.0, %v818_v37 }
 0x315   : > { %819 = vrcp.f32 %v364_v38  ;;  %v376_v44 = vand.u32 2147483648, %v364_v38  ;;  %vm370_vm7 = vweird.f32 %v364_v38  ;;  %v374_v45 = vand.u32 2147483647, %v364_v38 }
 0x317   : > { %v377_v47 = vor.u32 1.1754944e-38, %v376_v44  ;;  %vm375_vm9 = vcmp.eq.f32.partialorder %v374_v45, 8.507059e+37 }
 0x31b   : > { %v820_v39 = vpop.eup %819 }
 0x31c   : > { %v366_v40 = vmul.f32 %v820_v39, %v364_v38  ;;  %vm371_vm6 = vweird.f32 %v820_v39 }
 0x31d   : > { %vm372_vm8 = vmor %vm370_vm7, %vm371_vm6 }
 0x31e   : > { %v367_v41 = vsub.f32 1.0, %v366_v40 }
 0x320   : > { %v368_v42 = vmul.f32 %v820_v39, %v367_v41 }
 0x322   : > { %v369_v43 = vadd.f32 %v820_v39, %v368_v42 }
 0x324   : > { %v373_v46 = vsel %vm372_vm8, %v820_v39, %v369_v43 }
 0x325   : > { %v378_v49 = vsel %vm375_vm9, %v377_v47, %v373_v46 }
 0x362   : > { %v382_v48 = vpop.permute.xlu2 %381 }
 0x363   : > { %v384_v51 = vmul.f32 %v382_v48, %v378_v49 }
 0x365   : > { %v389_v52 = vadd.f32 %v387_v50, %v384_v51 }
 0x367   : > { %821 = vtanh.f32 %v389_v52 }
 0x36d   : > { %v822_v53 = vpop.eup %821 }
 0x36e   : > { %v391_v54 = vsub.f32 %v326_v31, %v822_v53 }
 0x370   : > { %393 = vrot.lane.b32.xlu1 %v391_v54, %s1021_s18 }
 0x3e2   : > { %v394_v55 = vpop.permute.xlu1 %393 }
 0x3e3   : > { %v396_v56 = vmul.f32 %v394_v55, %v378_v49 }
 0x3e5   : > { %398 = vrot.lane.b32.xlu2 %v396_v56, %s1022_s20 }
 0x3ed   : > { %462 = vrot.lane.b32.xlu2 %v708_v60, %s1021_s18 }
 0x43f   : > { %v399_v57 = vpop.permute.xlu2 %398 }
 0x440   : > { %v401_v58 = vadd.f32 %v822_v53, %v399_v57 }
 0x442   : > { %403 = vrot.lane.b32.xlu0 %v401_v58, %s1021_s18 }
 0x447   : > { %v463_v13 = vpop.permute.xlu2 %462 }
 0x4b4   : > { %v404_v59 = vpop.permute.xlu0 %403 }
 0x4b5   : > { %706 = vst.msk [vmem:[%s1169_s0 + $0x8] sm:$0xff] %vm260_vm1, %v404_v59  ;;  %707 = vmatmul.msk.f32.vlgmr.msra.gmra.mxu2 %vm260_vm1, %v404_v59 }
 0x538   : > { %v431_v61 = vpop.f32.mrf.mxu2 }
 0x539   : > { %v436_v62 = vadd.f32 %v708_v60, %v431_v61  ;;  %457 = vrot.lane.b32.xlu1 %v431_v61, %s1021_s18 }
 0x53b   : > { %v709_v63 = vmul.f32 -1.442695, %v436_v62 }
 0x53d   : > { %823 = vpow2.f32 %v709_v63 }
 0x543   : > { %v824_v0 = vpop.eup %823 }
 0x544   : > { %v440_v1 = vadd.f32 1.0, %v824_v0 }
 0x546   : > { %825 = vrcp.f32 %v440_v1  ;;  %v452_v7 = vand.u32 2147483648, %v440_v1  ;;  %vm446_vm11 = vweird.f32 %v440_v1  ;;  %v450_v8 = vand.u32 2147483647, %v440_v1 }
 0x548   : > { %v453_v10 = vor.u32 1.1754944e-38, %v452_v7  ;;  %vm451_vm13 = vcmp.eq.f32.partialorder %v450_v8, 8.507059e+37 }
 0x54c   : > { %v826_v2 = vpop.eup %825 }
 0x54d   : > { %v442_v3 = vmul.f32 %v826_v2, %v440_v1  ;;  %vm447_vm10 = vweird.f32 %v826_v2 }
 0x54e   : > { %vm448_vm12 = vmor %vm446_vm11, %vm447_vm10 }
 0x54f   : > { %v443_v4 = vsub.f32 1.0, %v442_v3 }
 0x551   : > { %v444_v5 = vmul.f32 %v826_v2, %v443_v4 }
 0x553   : > { %v445_v6 = vadd.f32 %v826_v2, %v444_v5 }
 0x555   : > { %v449_v9 = vsel %vm448_vm12, %v826_v2, %v445_v6 }
 0x556   : > { %v454_v12 = vsel %vm451_vm13, %v453_v10, %v449_v9 }
 0x5ab   : > { %v458_v11 = vpop.permute.xlu1 %457 }
 0x5ac   : > { %v460_v14 = vmul.f32 %v458_v11, %v454_v12 }
 0x5ae   : > { %v465_v15 = vadd.f32 %v463_v13, %v460_v14 }
 0x5b0   : > { %827 = vtanh.f32 %v465_v15 }
 0x5b6   : > { %v828_v16 = vpop.eup %827 }
 0x5b7   : > { %v467_v17 = vsub.f32 %v401_v58, %v828_v16 }
 0x5b9   : > { %469 = vrot.lane.b32.xlu0 %v467_v17, %s1021_s18 }
 0x62b   : > { %v470_v18 = vpop.permute.xlu0 %469 }
 0x62c   : > { %v472_v19 = vmul.f32 %v470_v18, %v454_v12 }
 0x62e   : > { %474 = vrot.lane.b32.xlu1 %v472_v19, %s1022_s20 }
 0x636   : > { %538 = vrot.lane.b32.xlu1 %v712_v23, %s1021_s18 }
 0x6a0   : > { %v475_v20 = vpop.permute.xlu1 %474 }
 0x6a1   : > { %v477_v21 = vadd.f32 %v828_v16, %v475_v20 }
 0x6a3   : > { %479 = vrot.lane.b32.xlu2 %v477_v21, %s1021_s18 }
 0x6a8   : > { %v539_v40 = vpop.permute.xlu1 %538 }
 0x6fd   : > { %v480_v22 = vpop.permute.xlu2 %479 }
 0x6fe   : > { %710 = vst.msk [vmem:[%s1169_s0 + $0x10] sm:$0xff] %vm260_vm1, %v480_v22  ;;  %711 = vmatmul.msk.f32.vlgmr.msra.gmra.mxu3 %vm260_vm1, %v480_v22 }
 0x781   : > { %v507_v24 = vpop.f32.mrf.mxu3 }
 0x782   : > { %v512_v25 = vadd.f32 %v712_v23, %v507_v24  ;;  %533 = vrot.lane.b32.xlu0 %v507_v24, %s1021_s18 }
 0x784   : > { %v713_v26 = vmul.f32 -1.442695, %v512_v25 }
 0x786   : > { %829 = vpow2.f32 %v713_v26 }
 0x78c   : > { %v830_v27 = vpop.eup %829 }
 0x78d   : > { %v516_v28 = vadd.f32 1.0, %v830_v27 }
 0x78f   : > { %831 = vrcp.f32 %v516_v28  ;;  %v528_v34 = vand.u32 2147483648, %v516_v28  ;;  %vm522_vm15 = vweird.f32 %v516_v28  ;;  %v526_v35 = vand.u32 2147483647, %v516_v28 }
 0x791   : > { %v529_v37 = vor.u32 1.1754944e-38, %v528_v34  ;;  %vm527_vm2 = vcmp.eq.f32.partialorder %v526_v35, 8.507059e+37 }
 0x795   : > { %v832_v29 = vpop.eup %831 }
 0x796   : > { %v518_v30 = vmul.f32 %v832_v29, %v516_v28  ;;  %vm523_vm14 = vweird.f32 %v832_v29 }
 0x797   : > { %vm524_vm0 = vmor %vm522_vm15, %vm523_vm14 }
 0x798   : > { %v519_v31 = vsub.f32 1.0, %v518_v30 }
 0x79a   : > { %v520_v32 = vmul.f32 %v832_v29, %v519_v31 }
 0x79c   : > { %v521_v33 = vadd.f32 %v832_v29, %v520_v32 }
 0x79e   : > { %v525_v36 = vsel %vm524_vm0, %v832_v29, %v521_v33 }
 0x79f   : > { %v530_v39 = vsel %vm527_vm2, %v529_v37, %v525_v36 }
 0x7f4   : > { %v534_v38 = vpop.permute.xlu0 %533 }
 0x7f5   : > { %v536_v41 = vmul.f32 %v534_v38, %v530_v39 }
 0x7f7   : > { %v541_v42 = vadd.f32 %v539_v40, %v536_v41 }
 0x7f9   : > { %833 = vtanh.f32 %v541_v42 }
 0x7ff   : > { %v834_v43 = vpop.eup %833 }
 0x800   : > { %v543_v44 = vsub.f32 %v477_v21, %v834_v43 }
 0x802   : > { %545 = vrot.lane.b32.xlu2 %v543_v44, %s1021_s18 }
 0x85c   : > { %v546_v45 = vpop.permute.xlu2 %545 }
 0x85d   : > { %v548_v46 = vmul.f32 %v546_v45, %v530_v39 }
 0x85f   : > { %550 = vrot.lane.b32.xlu0 %v548_v46, %s1022_s20 }
 0x8d1   : > { %v551_v47 = vpop.permute.xlu0 %550 }
 0x8d2   : > { %v553_v48 = vadd.f32 %v834_v43, %v551_v47 }
 0x8d4   : > { %555 = vrot.lane.b32.xlu1 %v553_v48, %s1021_s18 }
 0x946   : > { %v556_v49 = vpop.permute.xlu1 %555 }
 0x947   : > { %714 = vst.msk [vmem:[%s1169_s0 + $0x18] sm:$0xff] %vm260_vm1, %v556_v49 }
 0x948   : > { %560 = vst.msk [vmem:[#allocation2] sm:$0xff] %vm260_vm1, %v556_v49 }
 0x949   : > { %952 = shalt.err (!%p949_p3)
}
 0x94a   : > { %s1023_s10 = smov 128   ;;  %s1024_s24 = smov 8  }
 0x94b   : > { %732 = dma.vmem_to_hbm [thread:$0]  (%p1127_p7), %s576_s28, 512, %s578_s29, %s562_s30, %s1023_s10, %s1023_s10, %s1024_s24  }
 0x94c PF: > { %s592_s0 = sand.u32 1, %s995_s12   ;;  %p746_p5 = pnand %p691_p11, %p1090_p6 }
 0x94d   : > { %s593_s18 = scalar_lea.sflag [#allocation5], %s592_s0 }
 0x94e   : > { %p747_p9 = pneg %p746_p5 }
 0x950   : > { %990 = dma.done.wait (%p747_p9), %s593_s18, 512  }
 0x951   : > { %992 = vsyncadd (%p747_p9), %s593_s18, 4294966784  ;;  %s20_s17 = sadd.s32 1, %s1015_s17   ;;  %s1264_s12 = smov %s999_s13 }
 0x952   : > { %p17_p2 = scmp.ge.s32.totalorder %s20_s17, 4   ;;  %s1265_s13 = smov %s1003_s14 }
 0x953   : > { %s1266_s14 = smov %s1137_s26  ;;  %s1267_s15 = smov %s1011_s16 }
 0x954   : > { %s1268_s16 = smov %s1270_s8  ;;  %19 = sbr.rel (!%p17_p2) target bundleno = 9 (0x9), region = 97 }
 0x959   :  { %599 = vsyncpa [#allocation4], 1 }
 0x95a   :  { %601 = vsyncpa [#allocation4 + $0x1], 1 }
 0x95b   :  { %602 = vsyncpa [#allocation7], 1 }
 0x95c   :  { %604 = vsyncpa [#allocation7 + $0x1], 1 }
 0x95d   :  { %605 = vsyncpa [#allocation5], 1 }
 0x95e   :  { %607 = vsyncpa [#allocation5 + $0x1], 1 }

</bundles_post_ra>
